<compile_context>
chip_gen: v7x
topology: tpu7x:2x2x1
jax: 0.10.0
libtpu: 0.0.40
codegen_flags: <defaults>
</compile_context>

<pallas_src>
import functools

import jax
import jax.numpy as jnp
from jax import lax
from jax.experimental import pallas as pl
from jax.experimental.pallas import tpu as pltpu


def _round_up(x, m):
    return (x + m - 1) // m * m


# ----------------------------------------------------------------------------
# Kernel
# ----------------------------------------------------------------------------
def rbm_forward_kernel(v_ref, w_ref, hb_ref, vb_ref, uh_ref, uv_ref,
                       vprob_ref, *, k):
    v = v_ref[...]          # (Bp, Vp) f32
    W = w_ref[...]          # (Hp, Vp) bf16, zero padded
    hb = hb_ref[...]        # (1, Hp)  f32
    vb = vb_ref[...]        # (1, Vp)  f32

    # v -> h: contract last dims of both operands so W is consumed untransposed.
    dn_vh = (((1,), (1,)), ((), ()))

    def v_to_h_sample(v_act, u):
        logits = lax.dot_general(v_act.astype(jnp.bfloat16), W, dn_vh,
                                 preferred_element_type=jnp.float32) + hb
        p_h = jax.nn.sigmoid(logits)
        return (u < p_h).astype(jnp.float32)          # Bernoulli(p_h)

    def h_to_v_prob(h_act):
        return jax.nn.sigmoid(
            jnp.dot(h_act.astype(jnp.bfloat16), W,
                    preferred_element_type=jnp.float32) + vb)

    # Initial half-step: v -> h_sample.
    h_sample = v_to_h_sample(v, uh_ref[0])

    # k-1 full Gibbs steps (h -> v_sample -> h_sample).  The final iteration's
    # dead tail (last v_sample and last v->h) is never computed.
    if k > 1:
        def body(i, h_s):
            v_s = (uv_ref[i] < h_to_v_prob(h_s)).astype(jnp.float32)
            return v_to_h_sample(v_s, uh_ref[i + 1])
        h_sample = lax.fori_loop(0, k - 1, body, h_sample, unroll=(k <= 8))

    # Final h -> v probability: the only value forward() returns.
    vprob_ref[...] = h_to_v_prob(h_sample)


# ----------------------------------------------------------------------------
# Wrapper
# ----------------------------------------------------------------------------
def _prepare_inputs(v, W, h_bias, v_bias, seed, k):
    B, V = v.shape
    H, Vw = W.shape
    assert Vw == V

    Bp = _round_up(B, 8)
    Hp = _round_up(H, 128)
    Vp = _round_up(V, 128)

    def pad2(x, r, c):
        return jnp.pad(x, ((0, r - x.shape[0]), (0, c - x.shape[1])))

    v_p = pad2(v.astype(jnp.float32), Bp, Vp)
    W_p = pad2(W.astype(jnp.float32), Hp, Vp).astype(jnp.bfloat16)
    hb_p = jnp.pad(h_bias.astype(jnp.float32), (0, Hp - H)).reshape(1, Hp)
    vb_p = jnp.pad(v_bias.astype(jnp.float32), (0, Vp - V)).reshape(1, Vp)

    key = jax.random.PRNGKey(seed)
    k_h, k_v = jax.random.split(key)
    # Pre-generated Bernoulli noise (off the kernel's serial critical path).
    u_h = jax.random.uniform(k_h, (k, Bp, Hp), dtype=jnp.float32)
    u_v = jax.random.uniform(k_v, (max(k - 1, 1), Bp, Vp), dtype=jnp.float32)

    return v_p, W_p, hb_p, vb_p, u_h, u_v, (B, V, Bp, Hp, Vp)


def rbm_forward(v, W, h_bias, v_bias, *, seed=0, k=1):
    """Mirror of RBM.forward: returns (v, v_prob)."""
    if k < 1:
        raise ValueError("RBM forward requires k >= 1")

    v_p, W_p, hb_p, vb_p, u_h, u_v, (B, V, Bp, Hp, Vp) = _prepare_inputs(
        v, W, h_bias, v_bias, seed, k)

    # 2k matmuls of (Bp,*)x(Hp,Vp); 2k sigmoid blocks.
    flops = 2 * (2 * k) * Bp * Hp * Vp
    transcendentals = (2 * k) * Bp * max(Hp, Vp)
    bytes_accessed = (v_p.size + hb_p.size + vb_p.size + u_h.size + u_v.size
                      + Bp * Vp) * 4 + W_p.size * 2

    vmem = pltpu.MemorySpace.VMEM
    v_prob_p = pl.pallas_call(
        functools.partial(rbm_forward_kernel, k=k),
        out_shape=jax.ShapeDtypeStruct((Bp, Vp), jnp.float32),
        in_specs=[
            pl.BlockSpec(memory_space=vmem),   # v        (Bp, Vp)
            pl.BlockSpec(memory_space=vmem),   # W        (Hp, Vp) bf16
            pl.BlockSpec(memory_space=vmem),   # h_bias   (1, Hp)
            pl.BlockSpec(memory_space=vmem),   # v_bias   (1, Vp)
            pl.BlockSpec(memory_space=vmem),   # u_h      (k, Bp, Hp)
            pl.BlockSpec(memory_space=vmem),   # u_v      (max(k-1,1), Bp, Vp)
        ],
        out_specs=pl.BlockSpec(memory_space=vmem),
        cost_estimate=pl.CostEstimate(flops=flops,
                                      transcendentals=transcendentals,
                                      bytes_accessed=bytes_accessed),
    )(v_p, W_p, hb_p, vb_p, u_h, u_v)

    return v, v_prob_p[:B, :V]


# Pure-JAX reference with identical padding, noise, and bf16 MXU casts.
def _rbm_forward_reference(v, W, h_bias, v_bias, *, seed=0, k=1):
    v_p, W_p, hb_p, vb_p, u_h, u_v, (B, V, *_rest) = _prepare_inputs(
        v, W, h_bias, v_bias, seed, k)

    def v_to_h_sample(v_act, u):
        p_h = jax.nn.sigmoid(
            jnp.dot(v_act.astype(jnp.bfloat16), W_p.T,
                    preferred_element_type=jnp.float32) + hb_p)
        return (u < p_h).astype(jnp.float32)

    def h_to_v_prob(h_act):
        return jax.nn.sigmoid(
            jnp.dot(h_act.astype(jnp.bfloat16), W_p,
                    preferred_element_type=jnp.float32) + vb_p)

    h_s = v_to_h_sample(v_p, u_h[0])
    for i in range(k - 1):
        v_s = (u_v[i] < h_to_v_prob(h_s)).astype(jnp.float32)
        h_s = v_to_h_sample(v_s, u_h[i + 1])
    return h_to_v_prob(h_s)[:B, :V]


if __name__ == "__main__":
    # Small deterministic setup consistent with RBM.__init__:
    #   W ~ N(0, 0.01^2), biases zero, binary visible input.
    batch = 8
    n_visible = 64
    n_hidden = 32
    k = 1

    key = jax.random.PRNGKey(0)
    k_w, k_v = jax.random.split(key)

    W = 0.01 * jax.random.normal(k_w, (n_hidden, n_visible), dtype=jnp.float32)
    h_bias = jnp.zeros((n_hidden,), dtype=jnp.float32)
    v_bias = jnp.zeros((n_visible,), dtype=jnp.float32)
    v = (jax.random.uniform(k_v, (batch, n_visible)) < 0.5).astype(jnp.float32)

    v_out, v_prob = rbm_forward(v, W, h_bias, v_bias, seed=0, k=k)
    jax.block_until_ready((v_out, v_prob))

    assert v_out.shape == (batch, n_visible)
    assert v_prob.shape == (batch, n_visible)
    assert bool(jnp.all((v_prob >= 0.0) & (v_prob <= 1.0)))

    v_prob_ref = _rbm_forward_reference(v, W, h_bias, v_bias, seed=0, k=k)
    assert bool(jnp.max(jnp.abs(v_prob - v_prob_ref)) < 5e-2)

    print("KERNEL_OK")
</pallas_src>

<mosaic_0001>
module attributes {stable_mosaic.version = 11 : i64} {
  func.func @rbm_forward_kernel(%arg0: memref<8x128xf32, #tpu.memory_space<vmem>>, %arg1: memref<128x128xbf16, #tpu.memory_space<vmem>>, %arg2: memref<1x128xf32, #tpu.memory_space<vmem>>, %arg3: memref<1x128xf32, #tpu.memory_space<vmem>>, %arg4: memref<1x8x128xf32, #tpu.memory_space<vmem>>, %arg5: memref<1x8x128xf32, #tpu.memory_space<vmem>>, %arg6: memref<8x128xf32, #tpu.memory_space<vmem>>) attributes {dimension_semantics = [], scalar_prefetch = 0 : i64, scratch_operands = 0 : i64, tpu.core_type = #tpu.core_type<tc>} {
    %c0 = arith.constant 0 : index
    %c0_0 = arith.constant 0 : index
    %0 = vector.load %arg0[%c0, %c0_0] : memref<8x128xf32, #tpu.memory_space<vmem>>, vector<8x128xf32>
    %c0_1 = arith.constant 0 : index
    %c0_2 = arith.constant 0 : index
    %1 = vector.load %arg1[%c0_1, %c0_2] : memref<128x128xbf16, #tpu.memory_space<vmem>>, vector<128x128xbf16>
    %c0_3 = arith.constant 0 : index
    %c0_4 = arith.constant 0 : index
    %2 = vector.load %arg2[%c0_3, %c0_4] : memref<1x128xf32, #tpu.memory_space<vmem>>, vector<1x128xf32>
    %c0_5 = arith.constant 0 : index
    %c0_6 = arith.constant 0 : index
    %3 = vector.load %arg3[%c0_5, %c0_6] : memref<1x128xf32, #tpu.memory_space<vmem>>, vector<1x128xf32>
    %c0_7 = arith.constant 0 : index
    %c0_8 = arith.constant 0 : index
    %c0_9 = arith.constant 0 : index
    %4 = vector.load %arg4[%c0_7, %c0_8, %c0_9] : memref<1x8x128xf32, #tpu.memory_space<vmem>>, vector<1x8x128xf32>
    %5 = vector.shape_cast %4 : vector<1x8x128xf32> to vector<8x128xf32>
    %6 = arith.truncf %0 : vector<8x128xf32> to vector<8x128xbf16>
    %cst = arith.constant dense<0.000000e+00> : vector<8x128xf32>
    %7 = tpu.matmul %6, %1, %cst {dimension_numbers = #tpu.dot_dimension_numbers<[1], [1], [0], [0], [0, 0, 1, 0], [], []>} : vector<8x128xbf16>, vector<128x128xbf16>, vector<8x128xf32> -> vector<8x128xf32>
    %8 = vector.broadcast %2 : vector<1x128xf32> to vector<8x128xf32>
    %9 = arith.addf %7, %8 : vector<8x128xf32>
    %10 = arith.negf %9 : vector<8x128xf32>
    %11 = math.exp %10 : vector<8x128xf32>
    %cst_10 = arith.constant 1.000000e+00 : f32
    %12 = vector.broadcast %cst_10 : f32 to vector<8x128xf32>
    %13 = arith.addf %12, %11 : vector<8x128xf32>
    %14 = arith.divf %12, %13 : vector<8x128xf32>
    %15 = arith.cmpf olt, %5, %14 : vector<8x128xf32>
    %16 = arith.extui %15 : vector<8x128xi1> to vector<8x128xi32>
    %17 = arith.sitofp %16 : vector<8x128xi32> to vector<8x128xf32>
    %18 = arith.truncf %17 : vector<8x128xf32> to vector<8x128xbf16>
    %cst_11 = arith.constant dense<0.000000e+00> : vector<8x128xf32>
    %19 = tpu.matmul %18, %1, %cst_11 {dimension_numbers = #tpu.dot_dimension_numbers<[1], [0], [0], [1], [0, 0, 1, 1], [], []>} : vector<8x128xbf16>, vector<128x128xbf16>, vector<8x128xf32> -> vector<8x128xf32>
    %20 = vector.broadcast %3 : vector<1x128xf32> to vector<8x128xf32>
    %21 = arith.addf %19, %20 : vector<8x128xf32>
    %22 = arith.negf %21 : vector<8x128xf32>
    %23 = math.exp %22 : vector<8x128xf32>
    %cst_12 = arith.constant 1.000000e+00 : f32
    %24 = vector.broadcast %cst_12 : f32 to vector<8x128xf32>
    %25 = arith.addf %24, %23 : vector<8x128xf32>
    %26 = arith.divf %24, %25 : vector<8x128xf32>
    %c0_13 = arith.constant 0 : index
    %c0_14 = arith.constant 0 : index
    %27 = vector.load %arg6[%c0_13, %c0_14] : memref<8x128xf32, #tpu.memory_space<vmem>>, vector<8x128xf32>
    tpu.vector_store %arg6[%c0_13, %c0_14], %26 {strides = array<i32>} : memref<8x128xf32, #tpu.memory_space<vmem>>, vector<8x128xf32>,
    return
  }
}

</mosaic_0001>

<bundles_post_ra>
// kernel: tpu_custom_call.1
= control target key start
LH: loop header
LB: loop body
LE: loop exit
PB: predicated region body
PF: predicated region fallthrough
CT: control target
= control target key end

     0   :  { %11 = vsyncpa [#allocation3], 0  ;;  %s509_s0 = inlined_call_operand.hbm [shape: f32[8,128], index: 0, kind: input, shape index: {}]   ;;  %s510_s1 = inlined_call_operand.hbm [shape: bf16[128,128], index: 1, kind: input, shape index: {}]   ;;  %s511_s2 = inlined_call_operand.vmem [shape: f32[1,128], index: 2, kind: input, shape index: {}]   ;;  %s512_s3 = inlined_call_operand.vmem [shape: f32[1,128], index: 3, kind: input, shape index: {}]   ;;  %s513_s4 = inlined_call_operand.vmem [shape: f32[1,8,128], index: 4, kind: input, shape index: {}]   ;;  %s514_s5 = inlined_call_operand.vmem [shape: f32[1,8,128], index: 5, kind: input, shape index: {}]   ;;  %s515_s6 = inlined_call_operand.hbm [shape: f32[8,128], index: 6, kind: output, shape index: {}]  }
   0x1   :  { %12 = vsyncpa [#allocation6], 0 }
   0x2   :  { %13 = vsyncpa [#allocation4], 0  ;;  %s414_s21 = smov [#allocation2]   ;;  %s415_s23 = smov [#allocation5]  }
   0x3   :  { %s20_s22 = sshll.u32 %s414_s21, 4  ;;  %s29_s24 = sshll.u32 %s415_s23, 4  ;;  %s21_s22 = int_to_ptr.vmem [resolvable:$true] %s20_s22  ;;  %s457_s24 = int_to_ptr.vmem [resolvable:$true] %s29_s24 }
   0x4   :  { %s342_s27 = scalar_lea.hbm %s509_s0, 128 }
   0x5   :  { %p343_p0 = scmp.ne.s32.totalorder %s509_s0, %s342_s27  ;;  %p346_p1 = scmp.lt.u32.totalorder %s342_s27, %s509_s0 }
   0x7   :  { %p348_p2 = pnand %p346_p1, %p343_p0 }
   0x9   :  { %351 = shalt.err (!%p348_p2)
}
   0xa   :  { %s352_s7 = scalar_lea.vmem %s21_s22, 128  ;;  %p357_p4 = scmp.lt.s32.totalorder %s21_s22, %s21_s22 }
   0xb   :  { %p353_p3 = scmp.ne.s32.totalorder %s21_s22, %s352_s7  ;;  %p358_p5 = scmp.lt.s32.totalorder %s352_s7, %s352_s7 }
   0xd   :  { %p359_p6 = por %p358_p5, %p357_p4 }
   0xf   :  { %p360_p7 = pnand %p359_p6, %p353_p3 }
  0x11   :  { %363 = shalt.err (!%p360_p7)
}
  0x12   :  { %23 = dma.hbm_to_vmem [thread:$0]  %s509_s0, 128, %s21_s22, [#allocation3]  }
  0x13   :  { %s364_s12 = scalar_lea.hbm %s510_s1, 1024 }
  0x14   :  { %p365_p8 = scmp.ne.s32.totalorder %s510_s1, %s364_s12  ;;  %p368_p9 = scmp.lt.u32.totalorder %s364_s12, %s510_s1 }
  0x16   :  { %p370_p10 = pnand %p368_p9, %p365_p8 }
  0x18   :  { %373 = shalt.err (!%p370_p10)
}
  0x19   :  { %s374_s17 = scalar_lea.vmem %s457_s24, 1024  ;;  %p379_p12 = scmp.lt.s32.totalorder %s457_s24, %s457_s24 }
  0x1a   :  { %p375_p11 = scmp.ne.s32.totalorder %s457_s24, %s374_s17  ;;  %p380_p13 = scmp.lt.s32.totalorder %s374_s17, %s374_s17 }
  0x1c   :  { %p381_p0 = por %p380_p13, %p379_p12 }
  0x1e   :  { %p382_p1 = pnand %p381_p0, %p375_p11 }
  0x20   :  { %385 = shalt.err (!%p382_p1)
}
  0x21   :  { %s416_s0 = smov 64   ;;  %s417_s18 = smov 4  }
  0x22   :  { %35 = dma.hbm_to_vmem [thread:$0]  %s510_s1, 1024, %s457_s24, [#allocation6], %s416_s0, %s416_s0, %s417_s18  }
  0x23   :  { %408 = dma.done.wait [#allocation3], 128  }
  0x24   :  { %409 = vsyncadd [#allocation3], 4294967168 }
  0x25   :  { %410 = dma.done.wait [#allocation6], 1024  }
  0x26   :  { %411 = vsyncadd [#allocation6], 4294966272  ;;  %v418_v0 = vmov 0.0   ;;  %vm419_vm0 = vmmov 0   ;;  %v326_v1 = vld [vmem:[#allocation5] sm:$0xff]   ;;  %v327_v2 = vld [vmem:[#allocation5 + $0x8] sm:$0xff]  }
  0x27   :  { %278 = vmatprep.subr.bf16.mxu0 %v418_v0  ;;  %294 = vmatprep.mubr.msk.bf16.mxu0 %vm419_vm0, %v418_v0  ;;  %v328_v3 = vld [vmem:[#allocation5 + $0x10] sm:$0xff]   ;;  %v329_v4 = vld [vmem:[#allocation5 + $0x18] sm:$0xff]   ;;  %v330_v5 = vld [vmem:[#allocation5 + $0x20] sm:$0xff]   ;;  %v420_v22 = vmov 1.0|1.0  }
  0x28   :  { %298 = vmatprep.subr.bf16.mxu1 %v418_v0  ;;  %314 = vmatprep.mubr.msk.bf16.mxu1 %vm419_vm0, %v418_v0  ;;  %v331_v6 = vld [vmem:[#allocation5 + $0x28] sm:$0xff]   ;;  %v332_v7 = vld [vmem:[#allocation5 + $0x30] sm:$0xff]   ;;  %v333_v8 = vld [vmem:[#allocation5 + $0x38] sm:$0xff]  }
  0x29   :  { %279 = vmatpush3.bf16.xpose.msra.mxu0 %v326_v1  ;;  %299 = vmatpush3.bf16.msra.mxu1 %v326_v1  ;;  %v51_v9 = vld [vmem:[#allocation2] sm:$0xff] }
  0x2a   :  { %280 = vmatprep.subr.bf16.mxu0 %v418_v0  ;;  %300 = vmatprep.subr.bf16.mxu1 %v418_v0  ;;  %v71_v10 = vpack.c.bf16 %v51_v9, %v51_v9  ;;  %v245_v11 = vld [vmem:[%s511_s2] ss:$0 sm:$0xff] }
  0x2b   :  { %v70_v20 = vld [vmem:[%s513_s4] sm:$0xff]  ;;  %s421_s4 = smov [#allocation7]  }
  0x2c   :  { %v256_v23 = vld [vmem:[%s512_s3] ss:$0 sm:$0xff]  ;;  %s235_s25 = sshll.u32 %s421_s4, 4  ;;  %s236_s25 = int_to_ptr.vmem [resolvable:$true] %s235_s25 }
  0x2d   :  { %301 = vmatpush3.bf16.msra.mxu1 %v327_v2  ;;  %s386_s26 = scalar_lea.vmem %s236_s25, 128  ;;  %p391_p3 = scmp.lt.s32.totalorder %s236_s25, %s236_s25 }
  0x2e   :  { %302 = vmatprep.subr.bf16.mxu1 %v418_v0  ;;  %p387_p2 = scmp.ne.s32.totalorder %s236_s25, %s386_s26  ;;  %p392_p4 = scmp.lt.s32.totalorder %s386_s26, %s386_s26 }
  0x30   :  { %p393_p5 = por %p392_p4, %p391_p3 }
  0x31   :  { %281 = vmatpush3.bf16.xpose.msra.mxu0 %v327_v2  ;;  %303 = vmatpush3.bf16.msra.mxu1 %v328_v3 }
  0x32   :  { %282 = vmatprep.subr.bf16.mxu0 %v418_v0  ;;  %304 = vmatprep.subr.bf16.mxu1 %v418_v0  ;;  %p394_p6 = pnand %p393_p5, %p387_p2 }
  0x35   :  { %305 = vmatpush3.bf16.msra.mxu1 %v329_v4 }
  0x36   :  { %306 = vmatprep.subr.bf16.mxu1 %v418_v0 }
  0x39   :  { %283 = vmatpush3.bf16.xpose.msra.mxu0 %v328_v3  ;;  %307 = vmatpush3.bf16.msra.mxu1 %v330_v5 }
  0x3a   :  { %284 = vmatprep.subr.bf16.mxu0 %v418_v0  ;;  %308 = vmatprep.subr.bf16.mxu1 %v418_v0 }
  0x3d   :  { %309 = vmatpush3.bf16.msra.mxu1 %v331_v6 }
  0x3e   :  { %310 = vmatprep.subr.bf16.mxu1 %v418_v0 }
  0x41   :  { %285 = vmatpush3.bf16.xpose.msra.mxu0 %v329_v4  ;;  %311 = vmatpush3.bf16.msra.mxu1 %v332_v7 }
  0x42   :  { %286 = vmatprep.subr.bf16.mxu0 %v418_v0  ;;  %312 = vmatprep.subr.bf16.mxu1 %v418_v0 }
  0x45   :  { %313 = vmatpush3.bf16.msra.mxu1 %v333_v8 }
  0x49   :  { %287 = vmatpush3.bf16.xpose.msra.mxu0 %v330_v5 }
  0x4a   :  { %288 = vmatprep.subr.bf16.mxu0 %v418_v0 }
  0x51   :  { %289 = vmatpush3.bf16.xpose.msra.mxu0 %v331_v6 }
  0x52   :  { %290 = vmatprep.subr.bf16.mxu0 %v418_v0 }
  0x59   :  { %291 = vmatpush3.bf16.xpose.msra.mxu0 %v332_v7 }
  0x5a   :  { %292 = vmatprep.subr.bf16.mxu0 %v418_v0 }
  0x61   :  { %293 = vmatpush3.bf16.xpose.msra.mxu0 %v333_v8 }
  0x68   :  { %295 = vmatmul.mubr.bf16.vlgmr.msra.gmra.mrb[0].mxu0 %v71_v10 }
 0x13b   :  { %v160_v12 = vpop.f32.mrb[0].mxu0 }
 0x13c   :  { %v161_v13 = vadd.f32 %v245_v11, %v160_v12  ;;  %v296_v14 = vpop.f32.mrb[1].mxu0 }
 0x13d   :  { %v163_v15 = vpop.f32.mrb[2].mxu0 }
 0x13e   :  { %v254_v16 = vmul.f32 -1.442695, %v161_v13  ;;  %v297_v17 = vpop.f32.mrb[3].mxu0 }
 0x140   :  { %334 = vpow2.f32 %v254_v16 }
 0x14a   :  { %v335_v18 = vpop.eup %334 }
 0x14b   :  { %v169_v19 = vadd.f32 1.0, %v335_v18 }
 0x14d   :  { %336 = vrcp.f32 %v169_v19 }
 0x157   :  { %v337_v21 = vpop.eup %336 }
 0x158   :  { %vm172_vm1 = vcmp.lt.f32.partialorder %v70_v20, %v337_v21 }
 0x159   :  { %vm257_vm2 = vmpackc.low %vm172_vm1, %vm172_vm1 }
 0x15a   :  { %315 = vmatmul.mubr.msk.bf16.vlgmr.msra.gmra.mrb[0].mxu1 %vm257_vm2, %v420_v22 }
 0x22d   :  { %v216_v24 = vpop.f32.mrb[0].mxu1 }
 0x22e   :  { %v217_v25 = vadd.f32 %v256_v23, %v216_v24  ;;  %v316_v26 = vpop.f32.mrb[1].mxu1 }
 0x22f   :  { %v219_v27 = vpop.f32.mrb[2].mxu1 }
 0x230   :  { %v259_v28 = vmul.f32 -1.442695, %v217_v25  ;;  %v317_v29 = vpop.f32.mrb[3].mxu1 }
 0x232   :  { %338 = vpow2.f32 %v259_v28 }
 0x23c   :  { %v339_v30 = vpop.eup %338 }
 0x23d   :  { %v225_v31 = vadd.f32 1.0, %v339_v30 }
 0x23f   :  { %340 = vrcp.f32 %v225_v31 }
 0x249   :  { %v341_v32 = vpop.eup %340 }
 0x24a   :  { %228 = vst [vmem:[#allocation7] sm:$0xff] %v341_v32 }
 0x24b   :  { %397 = shalt.err (!%p394_p6)
}
 0x24c   :  { %s398_s28 = scalar_lea.hbm %s515_s6, 128 }
 0x24d   :  { %p399_p7 = scmp.ne.s32.totalorder %s515_s6, %s398_s28  ;;  %p402_p8 = scmp.lt.u32.totalorder %s398_s28, %s515_s6 }
 0x24f   :  { %p404_p9 = pnand %p402_p8, %p399_p7 }
 0x251   :  { %407 = shalt.err (!%p404_p9)
}
 0x252   :  { %238 = dma.vmem_to_hbm [thread:$0]  %s236_s25, 128, %s515_s6, [#allocation4]  }
 0x253   :  { %412 = dma.done.wait [#allocation4], 128  }
 0x254   :  { %413 = vsyncadd [#allocation4], 4294967168 }
 0x255   :  { %242 = vsyncpa [#allocation3], 1 }
 0x256   :  { %243 = vsyncpa [#allocation6], 1 }
 0x257   :  { %244 = vsyncpa [#allocation4], 1 }

</bundles_post_ra>
